<compile_context>
chip_gen: v5e
topology: v5e:2x2
jax: 0.10.0
libtpu: 0.0.40
codegen_flags: <defaults>
</compile_context>

<pallas_src>
import jax
import jax.numpy as jnp
from jax.experimental import pallas as pl
from jax.experimental.pallas import tpu as pltpu

LANE = 128


def fused_graphsage_kernel(a_ref, invdeg_ref, x_ref,
                           w1_ref, b1_ref, w2_ref, b2_ref, o_ref):
    """Two fused SAGEConv('mean') layers; layer-1 activation stays on-chip."""
    # Row-normalized adjacency built ONCE (bf16 0/1 -> f32, scaled by 1/deg),
    # reused by both layers.
    a_norm = a_ref[...].astype(jnp.float32) * invdeg_ref[...]          # [N, N]

    x = x_ref[...]                                                     # [N, FP]

    # ---- layer 1: [x | mean_neigh(x)] @ [W_self1; W_neigh1] + b1, then ReLU
    neigh1 = jnp.dot(a_norm, x, preferred_element_type=jnp.float32)    # [N, FP]
    h = jnp.dot(jnp.concatenate([x, neigh1], axis=-1), w1_ref[...],
                preferred_element_type=jnp.float32) + b1_ref[...]      # [N, HP]
    h = jnp.maximum(h, 0.0)

    # ---- layer 2 (no ReLU); `h` never leaves VMEM
    neigh2 = jnp.dot(a_norm, h, preferred_element_type=jnp.float32)    # [N, HP]
    out = jnp.dot(jnp.concatenate([h, neigh2], axis=-1), w2_ref[...],
                  preferred_element_type=jnp.float32) + b2_ref[...]    # [N, HP]
    o_ref[...] = out.astype(o_ref.dtype)


def _pad2(arr, rows, cols):
    r, c = arr.shape
    return jnp.pad(arr, ((0, rows - r), (0, cols - c)))


def _stack_weights(w_self, w_neigh, fin_pad, h_pad):
    """Stack [fin,h] self/neigh weights into one lane-dense [2*fin_pad, h_pad]."""
    fin, h = w_self.shape
    w = jnp.zeros((2 * fin_pad, h_pad), jnp.float32)
    w = w.at[:fin, :h].set(w_self)
    w = w.at[fin_pad:fin_pad + fin, :h].set(w_neigh)
    return w


def graphsage_forward(a, x, params):
    """h = relu(conv1(g, x)); h = conv2(g, h) — one fused pallas_call."""
    n, in_feats = x.shape
    h_feats = params["w_self1"].shape[1]
    fp = ((in_feats + LANE - 1) // LANE) * LANE   # 8  -> 128
    hp = ((h_feats + LANE - 1) // LANE) * LANE    # 32 -> 128

    # Hoisted degree normalization (computed once, in f32, outside the kernel).
    deg = jnp.maximum(jnp.sum(a, axis=-1, keepdims=True), 1.0)          # [N, 1]
    inv_deg = 1.0 / deg

    a_bf16 = a.astype(jnp.bfloat16)   # entries are exactly 0/1 -> lossless cast
    x_pad = _pad2(x, n, fp)

    w1 = _stack_weights(params["w_self1"], params["w_neigh1"], fp, hp)  # [2fp, hp]
    b1 = _pad2(params["b1"], 1, hp)
    w2 = _stack_weights(params["w_self2"], params["w_neigh2"], hp, hp)  # [2hp, hp]
    b2 = _pad2(params["b2"], 1, hp)

    full = lambda arr: pl.BlockSpec(arr.shape, lambda: (0,) * arr.ndim)

    out_pad = pl.pallas_call(
        fused_graphsage_kernel,
        out_shape=jax.ShapeDtypeStruct((n, hp), jnp.float32),
        in_specs=[full(a_bf16), full(inv_deg), full(x_pad),
                  full(w1), full(b1), full(w2), full(b2)],
        out_specs=pl.BlockSpec((n, hp), lambda: (0, 0)),
        compiler_params=pltpu.CompilerParams(vmem_limit_bytes=64 * 1024 * 1024),
    )(a_bf16, inv_deg, x_pad, w1, b1, w2, b2)

    return out_pad[:, :h_feats]


def init_params(key, in_feats, h_feats):
    ks = jax.random.split(key, 6)
    s = 0.1
    return {
        "w_self1":  s * jax.random.normal(ks[0], (in_feats, h_feats), jnp.float32),
        "w_neigh1": s * jax.random.normal(ks[1], (in_feats, h_feats), jnp.float32),
        "b1":       s * jax.random.normal(ks[2], (1, h_feats), jnp.float32),
        "w_self2":  s * jax.random.normal(ks[3], (h_feats, h_feats), jnp.float32),
        "w_neigh2": s * jax.random.normal(ks[4], (h_feats, h_feats), jnp.float32),
        "b2":       s * jax.random.normal(ks[5], (1, h_feats), jnp.float32),
    }


def build_graph(n_nodes):
    """Deterministic small graph: ring edges i->(i+1)%N and skip edges i->(i+3)%N."""
    a = jnp.zeros((n_nodes, n_nodes), jnp.float32)
    for i in range(n_nodes):
        a = a.at[(i + 1) % n_nodes, i].set(1.0)   # A[dst, src]
        a = a.at[(i + 3) % n_nodes, i].set(1.0)
    return a


def reference_forward(a, x, params):
    """Pure-JAX reference for sanity check."""
    def conv(a, x, ws, wn, b):
        deg = jnp.maximum(a.sum(-1, keepdims=True), 1.0)
        neigh = (a @ x) / deg
        return x @ ws + neigh @ wn + b
    h = jax.nn.relu(conv(a, x, params["w_self1"], params["w_neigh1"], params["b1"]))
    return conv(a, h, params["w_self2"], params["w_neigh2"], params["b2"])


if __name__ == "__main__":
    N_NODES, IN_FEATS, H_FEATS = 16, 8, 32

    key = jax.random.PRNGKey(0)
    k_feat, k_param = jax.random.split(key)

    a = build_graph(N_NODES)                                          # [N, N]
    x = jax.random.normal(k_feat, (N_NODES, IN_FEATS), jnp.float32)   # [N, in_feats]
    params = init_params(k_param, IN_FEATS, H_FEATS)

    out = jax.block_until_ready(graphsage_forward(a, x, params))

    ref = reference_forward(a, x, params)
    assert out.shape == (N_NODES, H_FEATS)
    assert jnp.allclose(out, ref, atol=1e-4, rtol=1e-4), "mismatch vs reference"

    print("KERNEL_OK")
</pallas_src>

<mosaic_0001>
module attributes {stable_mosaic.version = 11 : i64} {
  func.func @fused_graphsage_kernel(%arg0: memref<16x16xbf16, #tpu.memory_space<vmem>>, %arg1: memref<16x1xf32, #tpu.memory_space<vmem>>, %arg2: memref<16x128xf32, #tpu.memory_space<vmem>>, %arg3: memref<256x128xf32, #tpu.memory_space<vmem>>, %arg4: memref<1x128xf32, #tpu.memory_space<vmem>>, %arg5: memref<256x128xf32, #tpu.memory_space<vmem>>, %arg6: memref<1x128xf32, #tpu.memory_space<vmem>>, %arg7: memref<16x128xf32, #tpu.memory_space<vmem>>) attributes {dimension_semantics = [], scalar_prefetch = 0 : i64, scratch_operands = 0 : i64, tpu.core_type = #tpu.core_type<tc>} {
    %c0 = arith.constant 0 : index
    %c0_0 = arith.constant 0 : index
    %0 = vector.load %arg0[%c0, %c0_0] : memref<16x16xbf16, #tpu.memory_space<vmem>>, vector<16x16xbf16>
    %1 = arith.extf %0 : vector<16x16xbf16> to vector<16x16xf32>
    %c0_1 = arith.constant 0 : index
    %c0_2 = arith.constant 0 : index
    %2 = vector.load %arg1[%c0_1, %c0_2] : memref<16x1xf32, #tpu.memory_space<vmem>>, vector<16x1xf32>
    %3 = vector.broadcast %2 : vector<16x1xf32> to vector<16x16xf32>
    %4 = arith.mulf %1, %3 : vector<16x16xf32>
    %c0_3 = arith.constant 0 : index
    %c0_4 = arith.constant 0 : index
    %5 = vector.load %arg2[%c0_3, %c0_4] : memref<16x128xf32, #tpu.memory_space<vmem>>, vector<16x128xf32>
    %cst = arith.constant dense<0.000000e+00> : vector<16x128xf32>
    %6 = tpu.matmul %4, %5, %cst {dimension_numbers = #tpu.dot_dimension_numbers<[1], [0], [0], [1], [0, 0, 1, 1], [], []>} : vector<16x16xf32>, vector<16x128xf32>, vector<16x128xf32> -> vector<16x128xf32>
    %7 = tpu.concatenate %5, %6 in 1 : vector<16x128xf32>, vector<16x128xf32> -> vector<16x256xf32>
    %c0_5 = arith.constant 0 : index
    %c0_6 = arith.constant 0 : index
    %8 = vector.load %arg3[%c0_5, %c0_6] : memref<256x128xf32, #tpu.memory_space<vmem>>, vector<256x128xf32>
    %cst_7 = arith.constant dense<0.000000e+00> : vector<16x128xf32>
    %9 = tpu.matmul %7, %8, %cst_7 {dimension_numbers = #tpu.dot_dimension_numbers<[1], [0], [0], [1], [0, 0, 1, 1], [], []>} : vector<16x256xf32>, vector<256x128xf32>, vector<16x128xf32> -> vector<16x128xf32>
    %c0_8 = arith.constant 0 : index
    %c0_9 = arith.constant 0 : index
    %10 = vector.load %arg4[%c0_8, %c0_9] : memref<1x128xf32, #tpu.memory_space<vmem>>, vector<1x128xf32>
    %11 = vector.broadcast %10 : vector<1x128xf32> to vector<16x128xf32>
    %12 = arith.addf %9, %11 : vector<16x128xf32>
    %cst_10 = arith.constant 0.000000e+00 : f32
    %13 = vector.broadcast %cst_10 : f32 to vector<16x128xf32>
    %14 = arith.maximumf %12, %13 : vector<16x128xf32>
    %cst_11 = arith.constant dense<0.000000e+00> : vector<16x128xf32>
    %15 = tpu.matmul %4, %14, %cst_11 {dimension_numbers = #tpu.dot_dimension_numbers<[1], [0], [0], [1], [0, 0, 1, 1], [], []>} : vector<16x16xf32>, vector<16x128xf32>, vector<16x128xf32> -> vector<16x128xf32>
    %16 = tpu.concatenate %14, %15 in 1 : vector<16x128xf32>, vector<16x128xf32> -> vector<16x256xf32>
    %c0_12 = arith.constant 0 : index
    %c0_13 = arith.constant 0 : index
    %17 = vector.load %arg5[%c0_12, %c0_13] : memref<256x128xf32, #tpu.memory_space<vmem>>, vector<256x128xf32>
    %cst_14 = arith.constant dense<0.000000e+00> : vector<16x128xf32>
    %18 = tpu.matmul %16, %17, %cst_14 {dimension_numbers = #tpu.dot_dimension_numbers<[1], [0], [0], [1], [0, 0, 1, 1], [], []>} : vector<16x256xf32>, vector<256x128xf32>, vector<16x128xf32> -> vector<16x128xf32>
    %c0_15 = arith.constant 0 : index
    %c0_16 = arith.constant 0 : index
    %19 = vector.load %arg6[%c0_15, %c0_16] : memref<1x128xf32, #tpu.memory_space<vmem>>, vector<1x128xf32>
    %20 = vector.broadcast %19 : vector<1x128xf32> to vector<16x128xf32>
    %21 = arith.addf %18, %20 : vector<16x128xf32>
    %c0_17 = arith.constant 0 : index
    %c0_18 = arith.constant 0 : index
    %22 = vector.load %arg7[%c0_17, %c0_18] : memref<16x128xf32, #tpu.memory_space<vmem>>, vector<16x128xf32>
    tpu.vector_store %arg7[%c0_17, %c0_18], %21 {strides = array<i32>} : memref<16x128xf32, #tpu.memory_space<vmem>>, vector<16x128xf32>,
    return
  }
}

</mosaic_0001>

<bundles_post_ra>
// kernel: tpu_custom_call.1
= control target key start
LH: loop header
LB: loop body
LE: loop exit
PB: predicated region body
PF: predicated region fallthrough
CT: control target
= control target key end

     0   :  { %12 = vsyncpa [#allocation3], 0  ;;  %s565_s0 = inlined_call_operand.hbm [shape: bf16[16,16], index: 0, kind: input, shape index: {}]   ;;  %s566_s1 = inlined_call_operand.vmem [shape: f32[16,1], index: 1, kind: input, shape index: {}]   ;;  %s567_s2 = inlined_call_operand.vmem [shape: f32[16,128], index: 2, kind: input, shape index: {}]   ;;  %s568_s3 = inlined_call_operand.hbm [shape: f32[256,128], index: 3, kind: input, shape index: {}]   ;;  %s569_s4 = inlined_call_operand.vmem [shape: f32[1,128], index: 4, kind: input, shape index: {}]   ;;  %s570_s5 = inlined_call_operand.hbm [shape: f32[256,128], index: 5, kind: input, shape index: {}]   ;;  %s571_s6 = inlined_call_operand.vmem [shape: f32[1,128], index: 6, kind: input, shape index: {}]   ;;  %s572_s7 = inlined_call_operand.hbm [shape: f32[16,128], index: 7, kind: output, shape index: {}]  }
   0x1   :  { %13 = vsyncpa [#allocation6], 0  ;;  %s36_s26 = sshll.u32 %s568_s3, 4  ;;  %s37_s26 = int_to_ptr.hbm [resolvable:$true] %s36_s26 }
   0x2   :  { %14 = vsyncpa [#allocation4], 0  ;;  %s457_s27 = smov [#allocation5]   ;;  %s19_s8 = sshll.u32 %s565_s0, 4  ;;  %s20_s8 = int_to_ptr.hbm [resolvable:$true] %s19_s8 }
   0x3   :  { %s38_s28 = sshll.u32 %s457_s27, 4  ;;  %s458_s9 = smov 128   ;;  %s39_s28 = int_to_ptr.vmem [resolvable:$true] %s38_s28 }
   0x4   :  { %s459_s10 = smov 8   ;;  %s460_s11 = smov [#allocation2]  }
   0x5   :  { %44 = dma.hbm_to_vmem [thread:$0]  %s37_s26, 4096, %s39_s28, [#allocation6], %s458_s9, %s458_s9, %s459_s10  }
   0x6   :  { %s21_s12 = sshll.u32 %s460_s11, 4  ;;  %s461_s3 = smov 64   ;;  %s22_s12 = int_to_ptr.vmem [resolvable:$true] %s21_s12 }
   0x7   :  { %s462_s13 = smov 4   ;;  %s51_s16 = sshll.u32 %s570_s5, 4  ;;  %s52_s16 = int_to_ptr.hbm [resolvable:$true] %s51_s16 }
   0x8   :  { %27 = dma.hbm_to_vmem [thread:$0]  %s20_s8, 128, %s22_s12, [#allocation3], %s461_s3, %s461_s3, %s462_s13  }
   0x9   :  { %s463_s17 = smov [#allocation7]  }
   0xa   :  { %s53_s0 = sshll.u32 %s463_s17, 4  ;;  %s54_s0 = int_to_ptr.vmem [resolvable:$true] %s53_s0 }
   0xb   :  { %59 = dma.hbm_to_vmem [thread:$0]  %s52_s16, 4096, %s54_s0, [#allocation6], %s458_s9, %s458_s9, %s459_s10  }
   0xc   :  { %451 = dma.done.wait [#allocation3], 128  }
   0xd   :  { %452 = vsyncadd [#allocation3], 4294967168 }
   0xe   :  { %453 = dma.done.wait [#allocation6], 8192  }
   0xf   :  { %454 = vsyncadd [#allocation6], 4294959104  ;;  %v464_v0 = vmov 0   ;;  %v78_v1 = vld [vmem:[%s566_s1] sm:$0xff]  ;;  %v527_v2 = vld [vmem:[%s567_s2 + $0x8] sm:$0xff]  ;;  %vm94_vm0 = vcmask 130048  }
  0x10   :  { %352 = vset.pattern.permute.xlu0 %v464_v0  ;;  %115 = vmatpush.msra.mxu0 %v527_v2  ;;  %v79_v3 = vld [vmem:[%s566_s1 + $0x8] sm:$0xff]  ;;  %v536_v4 = vld [vmem:[%s567_s2] sm:$0xff]  ;;  %v154_v6 = vld [vmem:[#allocation5 + $0xf0] sm:$0xff]  ;;  %s465_s26 = smov [#allocation8]   ;;  %s321_s30 = sshll.u32 %s572_s7, 4  ;;  %s322_s30 = int_to_ptr.hbm [resolvable:$true] %s321_s30 }
  0x11   :  { %82 = vperm.xlu0 %352, %v78_v1   ;;  %v155_v5 = vld [vmem:[#allocation5 + $0xf8] sm:$0xff]  ;;  %v138_v8 = vld [vmem:[#allocation5 + $0x70] sm:$0xff]  ;;  %v153_v9 = vld [vmem:[#allocation5 + $0xe8] sm:$0xff]  ;;  %s319_s27 = sshll.u32 %s465_s26, 4  ;;  %s320_s27 = int_to_ptr.vmem [resolvable:$true] %s319_s27 }
  0x12   :  { %116 = vmatpush.msra.mxu0 %v536_v4  ;;  %v139_v7 = vld [vmem:[#allocation5 + $0x78] sm:$0xff]  ;;  %183 = vmatpush.msra.mxu2 %v155_v5  ;;  %v137_v10 = vld [vmem:[#allocation5 + $0x68] sm:$0xff]  ;;  %v152_v11 = vld [vmem:[#allocation5 + $0xe0] sm:$0xff] }
  0x13   :  { %160 = vmatpush.msra.mxu1 %v139_v7  ;;  %v136_v12 = vld [vmem:[#allocation5 + $0x60] sm:$0xff]  ;;  %v151_v13 = vld [vmem:[#allocation5 + $0xd8] sm:$0xff]  ;;  %v150_v15 = vld [vmem:[#allocation5 + $0xd0] sm:$0xff] }
  0x14   :  { %184 = vmatpush.msra.mxu2 %v154_v6  ;;  %v135_v14 = vld [vmem:[#allocation5 + $0x58] sm:$0xff]  ;;  %v134_v16 = vld [vmem:[#allocation5 + $0x50] sm:$0xff]  ;;  %v149_v17 = vld [vmem:[#allocation5 + $0xc8] sm:$0xff] }
  0x15   :  { %161 = vmatpush.msra.mxu1 %v138_v8  ;;  %v133_v18 = vld [vmem:[#allocation5 + $0x48] sm:$0xff]  ;;  %v148_v19 = vld [vmem:[#allocation5 + $0xc0] sm:$0xff]  ;;  %v147_v21 = vld [vmem:[#allocation5 + $0xb8] sm:$0xff] }
  0x16   :  { %185 = vmatpush.msra.mxu2 %v153_v9  ;;  %v132_v20 = vld [vmem:[#allocation5 + $0x40] sm:$0xff]  ;;  %v131_v22 = vld [vmem:[#allocation5 + $0x38] sm:$0xff]  ;;  %v146_v24 = vld [vmem:[#allocation5 + $0xb0] sm:$0xff] }
  0x17   :  { %162 = vmatpush.msra.mxu1 %v137_v10  ;;  %v340_v23 = vld [vmem:[#allocation2] sm:$0xff]   ;;  %v130_v25 = vld [vmem:[#allocation5 + $0x30] sm:$0xff]  ;;  %v145_v27 = vld [vmem:[#allocation5 + $0xa8] sm:$0xff] }
  0x18   :  { %186 = vmatpush.msra.mxu2 %v152_v11  ;;  %v341_v26 = vunpack.c.l.bf16 %v340_v23  ;;  %v129_v28 = vld [vmem:[#allocation5 + $0x28] sm:$0xff]  ;;  %v144_v29 = vld [vmem:[#allocation5 + $0xa0] sm:$0xff]  ;;  %v143_v33 = vld [vmem:[#allocation5 + $0x98] sm:$0xff]  ;;  %v342_v36 = vunpack.c.h.bf16 %v340_v23 }
  0x19   :  { %87 = vperm.xlu0 %352, %v79_v3   ;;  %163 = vmatpush.msra.mxu1 %v136_v12  ;;  %v128_v30 = vld [vmem:[#allocation5 + $0x20] sm:$0xff]  ;;  %v127_v34 = vld [vmem:[#allocation5 + $0x18] sm:$0xff]  ;;  %v142_v35 = vld [vmem:[#allocation5 + $0x90] sm:$0xff] }
  0x1a   :  { %187 = vmatpush.msra.mxu2 %v151_v13  ;;  %v141_v37 = vld [vmem:[#allocation5 + $0x88] sm:$0xff]  ;;  %v126_v40 = vld [vmem:[#allocation5 + $0x10] sm:$0xff]  ;;  %v140_v41 = vld [vmem:[#allocation5 + $0x80] sm:$0xff] }
  0x1b   :  { %164 = vmatpush.msra.mxu1 %v135_v14  ;;  %v125_v42 = vld [vmem:[#allocation5 + $0x8] sm:$0xff]  ;;  %v124_v43 = vld [vmem:[#allocation5] sm:$0xff]  ;;  %v246_v44 = vld [vmem:[#allocation7 + $0x78] sm:$0xff] }
  0x1c   :  { %188 = vmatpush.msra.mxu2 %v150_v15  ;;  %v245_v45 = vld [vmem:[#allocation7 + $0x70] sm:$0xff]  ;;  %267 = vmatpush.msrb.mxu0 %v246_v44  ;;  %v244_v46 = vld [vmem:[#allocation7 + $0x68] sm:$0xff]  ;;  %v243_v47 = vld [vmem:[#allocation7 + $0x60] sm:$0xff] }
  0x1d   :  { %165 = vmatpush.msra.mxu1 %v134_v16  ;;  %v242_v48 = vld [vmem:[#allocation7 + $0x58] sm:$0xff]  ;;  %v241_v49 = vld [vmem:[#allocation7 + $0x50] sm:$0xff]  ;;  %v240_v50 = vld [vmem:[#allocation7 + $0x48] sm:$0xff] }
  0x1e   :  { %189 = vmatpush.msra.mxu2 %v149_v17  ;;  %268 = vmatpush.msrb.mxu0 %v245_v45  ;;  %v239_v51 = vld [vmem:[#allocation7 + $0x40] sm:$0xff]  ;;  %v238_v52 = vld [vmem:[#allocation7 + $0x38] sm:$0xff]  ;;  %v237_v53 = vld [vmem:[#allocation7 + $0x30] sm:$0xff] }
  0x1f   :  { %166 = vmatpush.msra.mxu1 %v133_v18  ;;  %v236_v54 = vld [vmem:[#allocation7 + $0x28] sm:$0xff]  ;;  %v235_v55 = vld [vmem:[#allocation7 + $0x20] sm:$0xff]  ;;  %v234_v58 = vld [vmem:[#allocation7 + $0x18] sm:$0xff] }
  0x20   :  { %190 = vmatpush.msra.mxu2 %v148_v19  ;;  %269 = vmatpush.msrb.mxu0 %v244_v46  ;;  %v233_v59 = vld [vmem:[#allocation7 + $0x10] sm:$0xff]  ;;  %v232_v60 = vld [vmem:[#allocation7 + $0x8] sm:$0xff]  ;;  %v231_v61 = vld [vmem:[#allocation7] sm:$0xff] }
  0x21   :  { %167 = vmatpush.msra.mxu1 %v132_v20  ;;  %v353_v63 = vld [vmem:[%s569_s4] ss:$0 sm:$0xff]  ;;  %v261_v10 = vld [vmem:[#allocation7 + $0xf0] sm:$0xff]  ;;  %v260_v11 = vld [vmem:[#allocation7 + $0xe8] sm:$0xff] }
  0x22   :  { %191 = vmatpush.msra.mxu2 %v147_v21  ;;  %270 = vmatpush.msrb.mxu0 %v243_v47  ;;  %v262_v9 = vld [vmem:[#allocation7 + $0xf8] sm:$0xff]  ;;  %v259_v12 = vld [vmem:[#allocation7 + $0xe0] sm:$0xff]  ;;  %v257_v14 = vld [vmem:[#allocation7 + $0xd0] sm:$0xff] }
  0x23   :  { %168 = vmatpush.msra.mxu1 %v131_v22  ;;  %v258_v13 = vld [vmem:[#allocation7 + $0xd8] sm:$0xff]  ;;  %v256_v15 = vld [vmem:[#allocation7 + $0xc8] sm:$0xff]  ;;  %v255_v16 = vld [vmem:[#allocation7 + $0xc0] sm:$0xff] }
  0x24   :  { %192 = vmatpush.msra.mxu2 %v146_v24  ;;  %271 = vmatpush.msrb.mxu0 %v242_v48  ;;  %v254_v17 = vld [vmem:[#allocation7 + $0xb8] sm:$0xff]  ;;  %v253_v18 = vld [vmem:[#allocation7 + $0xb0] sm:$0xff]  ;;  %v252_v19 = vld [vmem:[#allocation7 + $0xa8] sm:$0xff] }
  0x25   :  { %169 = vmatpush.msra.mxu1 %v130_v25  ;;  %v251_v20 = vld [vmem:[#allocation7 + $0xa0] sm:$0xff]  ;;  %v250_v21 = vld [vmem:[#allocation7 + $0x98] sm:$0xff]  ;;  %v249_v22 = vld [vmem:[#allocation7 + $0x90] sm:$0xff] }
  0x26   :  { %193 = vmatpush.msra.mxu2 %v145_v27  ;;  %272 = vmatpush.msrb.mxu0 %v241_v49  ;;  %v248_v23 = vld [vmem:[#allocation7 + $0x88] sm:$0xff]  ;;  %v247_v24 = vld [vmem:[#allocation7 + $0x80] sm:$0xff] }
  0x27   :  { %170 = vmatpush.msra.mxu1 %v129_v28  ;;  %v354_v28 = vld [vmem:[%s571_s6] ss:$0 sm:$0xff] }
  0x28   :  { %194 = vmatpush.msra.mxu2 %v144_v29  ;;  %273 = vmatpush.msrb.mxu0 %v240_v50 }
  0x29   :  { %171 = vmatpush.msra.mxu1 %v128_v30 }
  0x2a   :  { %195 = vmatpush.msra.mxu2 %v143_v33  ;;  %274 = vmatpush.msrb.mxu0 %v239_v51 }
  0x2b   :  { %172 = vmatpush.msra.mxu1 %v127_v34 }
  0x2c   :  { %196 = vmatpush.msra.mxu2 %v142_v35  ;;  %275 = vmatpush.msrb.mxu0 %v238_v52 }
  0x2d   :  { %173 = vmatpush.msra.mxu1 %v126_v40 }
  0x2e   :  { %197 = vmatpush.msra.mxu2 %v141_v37  ;;  %276 = vmatpush.msrb.mxu0 %v237_v53 }
  0x2f   :  { %174 = vmatpush.msra.mxu1 %v125_v42 }
  0x30   :  { %198 = vmatpush.msra.mxu2 %v140_v41  ;;  %277 = vmatpush.msrb.mxu0 %v236_v54 }
  0x31   :  { %175 = vmatpush.msra.mxu1 %v124_v43 }
  0x32   :  { %176 = vmatmul.f32.vlgmr.msra.gmra.mxu1 %v536_v4  ;;  %278 = vmatpush.msrb.mxu0 %v235_v55 }
  0x34   :  { %279 = vmatpush.msrb.mxu0 %v234_v58 }
  0x36   :  { %280 = vmatpush.msrb.mxu0 %v233_v59 }
  0x38   :  { %281 = vmatpush.msrb.mxu0 %v232_v60 }
  0x3a   :  { %179 = vmatmul.f32.gmra.mxu1 %v527_v2  ;;  %282 = vmatpush.msrb.mxu0 %v231_v61 }
  0x83   :  { %v83_v31 = vpop.permute.xlu0 %82 }
  0x84   :  { %v539_v32 = vmul.f32 %v341_v26, %v83_v31 }
  0x86   :  { %335 = vmatmul.msk.f32.vlgmr.msra.gmra.mxu0 %vm94_vm0, %v539_v32 }
  0x8b   :  { %v88_v38 = vpop.permute.xlu0 %87 }
  0x8c   :  { %v543_v39 = vmul.f32 %v342_v36, %v88_v38 }
  0x8e   :  { %336 = vmatmul.msk.f32.gmra.mxu0 %vm94_vm0, %v543_v39 }
  0xaf   :  { %v177_v62 = vpop.f32.mrf.mxu1 }
  0xb0   :  { %v178_v0 = vadd.f32 %v353_v63, %v177_v62 }
  0xb7   :  { %v180_v3 = vpop.f32.mrf.mxu1 }
  0xb8   :  { %v181_v5 = vadd.f32 %v353_v63, %v180_v3 }
 0x103   :  { %v118_v56 = vpop.f32.mrf.mxu0 }
 0x104   :  { %199 = vmatmul.f32.vlgmr.msra.gmra.mxu2 %v118_v56 }
 0x10b   :  { %v121_v57 = vpop.f32.mrf.mxu0 }
 0x10c   :  { %202 = vmatmul.f32.gmra.mxu2 %v121_v57 }
 0x187   :  { %v200_v1 = vpop.f32.mrf.mxu2 }
 0x188   :  { %v201_v2 = vadd.f32 %v200_v1, %v178_v0 }
 0x18a   :  { %v206_v4 = vmax.f32 %v201_v2, 0.0 }
 0x18c   :  { %283 = vmatmul.f32.vlgmr.msrb.gmra.mxu0 %v206_v4 }
 0x18f   :  { %v203_v6 = vpop.f32.mrf.mxu2 }
 0x190   :  { %v204_v7 = vadd.f32 %v203_v6, %v181_v5 }
 0x192   :  { %v207_v8 = vmax.f32 %v204_v7, 0.0 }
 0x194   :  { %222 = vmatpush.msra.mxu3 %v207_v8  ;;  %286 = vmatmul.f32.gmra.mxu0 %v207_v8 }
 0x196   :  { %223 = vmatpush.msra.mxu3 %v206_v4 }
 0x197   :  { %337 = vmatmul.msk.f32.vlgmr.msra.gmra.mxu3 %vm94_vm0, %v539_v32 }
 0x198   :  { %290 = vmatpush.msrb.mxu3 %v262_v9 }
 0x19a   :  { %291 = vmatpush.msrb.mxu3 %v261_v10 }
 0x19c   :  { %292 = vmatpush.msrb.mxu3 %v260_v11 }
 0x19e   :  { %293 = vmatpush.msrb.mxu3 %v259_v12 }
 0x19f   :  { %338 = vmatmul.msk.f32.gmra.mxu3 %vm94_vm0, %v543_v39 }
 0x1a0   :  { %294 = vmatpush.msrb.mxu3 %v258_v13 }
 0x1a2   :  { %295 = vmatpush.msrb.mxu3 %v257_v14 }
 0x1a4   :  { %296 = vmatpush.msrb.mxu3 %v256_v15 }
 0x1a6   :  { %297 = vmatpush.msrb.mxu3 %v255_v16 }
 0x1a8   :  { %298 = vmatpush.msrb.mxu3 %v254_v17 }
 0x1aa   :  { %299 = vmatpush.msrb.mxu3 %v253_v18 }
 0x1ac   :  { %300 = vmatpush.msrb.mxu3 %v252_v19 }
 0x1ae   :  { %301 = vmatpush.msrb.mxu3 %v251_v20 }
 0x1b0   :  { %302 = vmatpush.msrb.mxu3 %v250_v21 }
 0x1b2   :  { %303 = vmatpush.msrb.mxu3 %v249_v22 }
 0x1b4   :  { %304 = vmatpush.msrb.mxu3 %v248_v23 }
 0x1b6   :  { %305 = vmatpush.msrb.mxu3 %v247_v24 }
 0x209   :  { %v284_v27 = vpop.f32.mrf.mxu0 }
 0x20a   :  { %v285_v29 = vadd.f32 %v354_v28, %v284_v27 }
 0x211   :  { %v287_v32 = vpop.f32.mrf.mxu0 }
 0x212   :  { %v288_v33 = vadd.f32 %v354_v28, %v287_v32 }
 0x21a   :  { %v225_v25 = vpop.f32.mrf.mxu3 }
 0x21b   :  { %306 = vmatmul.f32.vlgmr.msrb.gmra.mxu3 %v225_v25 }
 0x222   :  { %v228_v26 = vpop.f32.mrf.mxu3 }
 0x223   :  { %309 = vmatmul.f32.gmra.mxu3 %v228_v26 }
 0x29e   :  { %v307_v30 = vpop.f32.mrf.mxu3 }
 0x29f   :  { %v308_v31 = vadd.f32 %v307_v30, %v285_v29 }
 0x2a1   :  { %313 = vst [vmem:[#allocation8] sm:$0xff] %v308_v31 }
 0x2a6   :  { %v310_v34 = vpop.f32.mrf.mxu3 }
 0x2a7   :  { %v311_v35 = vadd.f32 %v310_v34, %v288_v33 }
 0x2a9   :  { %314 = vst [vmem:[#allocation8 + $0x8] sm:$0xff] %v311_v35 }
 0x2aa   :  { %327 = dma.vmem_to_hbm [thread:$0]  %s320_s27, 256, %s322_s30, [#allocation4], %s458_s9, %s458_s9, %s459_s10  }
 0x2ab   :  { %455 = dma.done.wait [#allocation4], 256  }
 0x2ac   :  { %456 = vsyncadd [#allocation4], 4294967040 }
 0x2ad   :  { %332 = vsyncpa [#allocation3], 1 }
 0x2ae   :  { %333 = vsyncpa [#allocation6], 1 }
 0x2af   :  { %334 = vsyncpa [#allocation4], 1 }

</bundles_post_ra>
